<compile_context>
chip_gen: v7x
topology: tpu7x:2x2x1
jax: 0.10.0
libtpu: 0.0.40
codegen_flags: <defaults>
</compile_context>

<pallas_src>
import functools

import jax
import jax.numpy as jnp
from jax.experimental import pallas as pl
from jax.experimental.pallas import tpu as pltpu


def _round_up(x, m):
    return ((x + m - 1) // m) * m


def _divisor_tile(n, cap):
    """Largest multiple of 128 that divides n and is <= cap (n % 128 == 0)."""
    t = max(128, (min(cap, n) // 128) * 128)
    while n % t != 0:
        t -= 128
    return t


def _vmem_limit_bytes():
    # v5e/v6e: 128 MiB VMEM per TensorCore; v7x: 64 MiB.  Leave headroom for
    # compiler-internal scratch; never ask for more than 96 MiB.
    try:
        cap = int(getattr(pltpu.get_tpu_info(), "vmem_capacity_bytes", 128 << 20))
    except Exception:  # pragma: no cover - conservative fallback
        cap = 128 << 20
    return min((cap * 3) // 4, 96 << 20)


def _stage2_usage(tm, tk, n_p, f_out_p, out_bytes, resident):
    u = 2 * tm * tk * 2                                       # adj double buffer (bf16)
    u += n_p * f_out_p * 2 if resident else 2 * tk * f_out_p * 2   # support
    u += tm * f_out_p * 4                                     # f32 accumulator
    u += 2 * tm * f_out_p * out_bytes                         # output double buffer
    return u


def _pick_stage2(n_p, f_out_p, out_bytes, budget):
    """(tm, tk, resident) for out = adj @ support under the VMEM budget."""
    resident = (n_p * f_out_p * 2) <= budget // 3
    # Keep >= 2 row tiles when possible so v7x's two TensorCores split rows.
    tm_cap = min(1024, max(128, n_p // 2))
    for tm in (1024, 512, 256, 128):
        if tm > tm_cap or n_p % tm:
            continue
        for tk in (2048, 1024, 512, 256, 128):
            if tk > n_p or n_p % tk:
                continue
            if _stage2_usage(tm, tk, n_p, f_out_p, out_bytes, resident) <= budget:
                return tm, tk, resident
    return 128, 128, False


def _pick_stage1(n_p, f_in_p, f_out_p, budget):
    """(tm1, tn1) for support = x @ W + b under the VMEM budget."""
    # TODO(synk): for very large f_in add a contraction grid axis + accumulator.
    for tm1 in (512, 256, 128):
        if tm1 > n_p or n_p % tm1:
            continue
        for tn1 in (1024, 512, 256, 128):
            if tn1 > f_out_p or f_out_p % tn1:
                continue
            usage = (2 * tm1 * f_in_p * 2 + 2 * f_in_p * tn1 * 2
                     + 2 * tn1 * 4 + 2 * tm1 * tn1 * 2)
            if usage <= budget:
                return tm1, tn1
    return 128, 128


# ---------------- Stage 1: support = x @ W + b (computed once) --------------
def _support_kernel(x_ref, w_ref, b_ref, out_ref):
    acc = jnp.dot(x_ref[...], w_ref[...], preferred_element_type=jnp.float32)
    out_ref[...] = (acc + b_ref[...]).astype(out_ref.dtype)


# ---------------- Stage 2: out = adj @ support (tiled + accumulated) --------
def _aggregate_resident_kernel(adj_ref, sup_ref, out_ref, acc_ref, *, tk):
    # support is fully VMEM-resident (constant index_map); slice the k-th slab.
    k = pl.program_id(1)

    @pl.when(k == 0)
    def _init():
        acc_ref[...] = jnp.zeros_like(acc_ref)

    start = pl.multiple_of(k * tk, tk)
    acc_ref[...] += jnp.dot(adj_ref[...], sup_ref[pl.ds(start, tk), :],
                            preferred_element_type=jnp.float32)

    @pl.when(k == pl.num_programs(1) - 1)
    def _flush():
        out_ref[...] = acc_ref[...].astype(out_ref.dtype)


def _aggregate_streamed_kernel(adj_ref, sup_ref, out_ref, acc_ref):
    k = pl.program_id(1)

    @pl.when(k == 0)
    def _init():
        acc_ref[...] = jnp.zeros_like(acc_ref)

    acc_ref[...] += jnp.dot(adj_ref[...], sup_ref[...],
                            preferred_element_type=jnp.float32)

    @pl.when(k == pl.num_programs(1) - 1)
    def _flush():
        out_ref[...] = acc_ref[...].astype(out_ref.dtype)


def graph_convolution(x, weight, bias, adj, *, compute_dtype=jnp.bfloat16):
    """x: [N, F_in], weight: [F_in, F_out], bias: [F_out] or None, adj: [N, N].

    adj may be pre-cast to `compute_dtype` (recommended: do it once outside,
    it is reused across layers); if N % 128 == 0 and the dtype matches, no
    padded/cast copy of adj is materialized here.  Returns [N, F_out] in
    x.dtype."""
    N, f_in = x.shape
    f_out = weight.shape[1]
    out_dtype = x.dtype
    out_bytes = jnp.dtype(out_dtype).itemsize

    f_in_p = _round_up(f_in, 128)
    f_out_p = _round_up(f_out, 128)
    n_p = _round_up(N, 128)

    vmem_limit = _vmem_limit_bytes()
    budget = int(vmem_limit * 0.85)

    tm1, tn1 = _pick_stage1(n_p, f_in_p, f_out_p, budget)
    tm, tk, resident = _pick_stage2(n_p, f_out_p, out_bytes, budget)

    # ---- prepare inputs (zero-padding is exact: padded rows/cols contribute
    # zero and are sliced off at the end) ----
    if N == n_p and adj.dtype == compute_dtype:
        adj_p = adj                                   # no copy, no extra HBM traffic
    else:
        adj_p = jnp.zeros((n_p, n_p), compute_dtype).at[:N, :N].set(
            adj.astype(compute_dtype))

    if (N, f_in) == (n_p, f_in_p) and x.dtype == compute_dtype:
        x_p = x
    else:
        x_p = jnp.zeros((n_p, f_in_p), compute_dtype).at[:N, :f_in].set(
            x.astype(compute_dtype))
    w_p = jnp.zeros((f_in_p, f_out_p), compute_dtype).at[:f_in, :f_out].set(
        weight.astype(compute_dtype))
    b = bias if bias is not None else jnp.zeros((f_out,), jnp.float32)
    b_p = jnp.zeros((1, f_out_p), jnp.float32).at[0, :f_out].set(
        b.astype(jnp.float32))

    # ---- Stage 1: support = x @ W + b (once, tiled rows x out-features) ----
    support = pl.pallas_call(
        _support_kernel,
        out_shape=jax.ShapeDtypeStruct((n_p, f_out_p), compute_dtype),
        grid=(n_p // tm1, f_out_p // tn1),
        in_specs=[
            pl.BlockSpec((tm1, f_in_p), lambda i, j: (i, 0)),   # x row tile
            pl.BlockSpec((f_in_p, tn1), lambda i, j: (0, j)),   # weight col tile
            pl.BlockSpec((1, tn1), lambda i, j: (0, j)),        # bias col tile
        ],
        out_specs=pl.BlockSpec((tm1, tn1), lambda i, j: (i, j)),
        compiler_params=pltpu.CompilerParams(
            dimension_semantics=("parallel", "parallel"),
            vmem_limit_bytes=vmem_limit),
    )(x_p, w_p, b_p)

    # ---- Stage 2: out = adj @ support (f32 accumulator, final dtype out) ----
    if resident:
        sup_spec = pl.BlockSpec((n_p, f_out_p), lambda i, k: (0, 0))  # DMA once
        kernel = functools.partial(_aggregate_resident_kernel, tk=tk)
    else:
        sup_spec = pl.BlockSpec((tk, f_out_p), lambda i, k: (k, 0))
        kernel = _aggregate_streamed_kernel

    # NOTE: if DMA shows up exposed in profiles, sweep
    # pipeline_mode=pl.Buffered(3) on the adj BlockSpec (cheap experiment).
    out_p = pl.pallas_call(
        kernel,
        out_shape=jax.ShapeDtypeStruct((n_p, f_out_p), out_dtype),
        grid=(n_p // tm, n_p // tk),
        in_specs=[
            pl.BlockSpec((tm, tk), lambda i, k: (i, k)),        # adj tile
            sup_spec,                                           # support
        ],
        out_specs=pl.BlockSpec((tm, f_out_p), lambda i, k: (i, 0)),
        scratch_shapes=[pltpu.VMEM((tm, f_out_p), jnp.float32)],
        compiler_params=pltpu.CompilerParams(
            dimension_semantics=("parallel", "arbitrary"),
            vmem_limit_bytes=vmem_limit),
    )(adj_p, support)

    if n_p != N or f_out_p != f_out:
        out_p = out_p[:N, :f_out]
    return out_p


def xavier_uniform(key, shape, dtype=jnp.float32):
    fan_in, fan_out = shape
    bound = (6.0 / (fan_in + fan_out)) ** 0.5
    return jax.random.uniform(key, shape, dtype, minval=-bound, maxval=bound)


if __name__ == "__main__":
    key = jax.random.PRNGKey(0)
    k_x, k_w, k_adj = jax.random.split(key, 3)

    N, in_features, out_features = 128, 32, 16

    # Parameters (matching the module's __init__ / initialize_weights):
    weight = xavier_uniform(k_w, (in_features, out_features))
    bias = jnp.zeros((out_features,), dtype=jnp.float32)      # nn.init.zeros_

    # Inputs: node features + a symmetric row-normalized adjacency matrix.
    x = jax.random.normal(k_x, (N, in_features), dtype=jnp.float32)
    a = (jax.random.uniform(k_adj, (N, N)) < 0.1).astype(jnp.float32)
    a = jnp.minimum(a + a.T + jnp.eye(N, dtype=jnp.float32), 1.0)
    adj = a / jnp.sum(a, axis=1, keepdims=True)                # row-normalized

    # Amortized pre-pass: cast adj to the streaming dtype ONCE (adj is reused
    # across GCN layers / training steps).  N % 128 == 0, so the kernel uses
    # it directly with no padded copy.
    adj_bf16 = adj.astype(jnp.bfloat16)

    out = graph_convolution(x, weight, bias, adj_bf16)
    out = jax.block_until_ready(out)

    # Reference check in plain JAX (f32); kernel streams bf16, accumulates f32.
    ref = adj @ (x @ weight + bias)
    assert out.shape == (N, out_features)
    assert jnp.allclose(out, ref, atol=5e-2, rtol=5e-2), float(
        jnp.max(jnp.abs(out - ref)))

    print("KERNEL_OK")
</pallas_src>

<mosaic_0001>
module attributes {stable_mosaic.version = 11 : i64} {
  func.func @_support_kernel(%arg0: i32, %arg1: i32, %arg2: memref<128x128xbf16, #tpu.memory_space<vmem>>, %arg3: memref<128x128xbf16, #tpu.memory_space<vmem>>, %arg4: memref<1x128xf32, #tpu.memory_space<vmem>>, %arg5: memref<128x128xbf16, #tpu.memory_space<vmem>>) attributes {dimension_semantics = [#tpu.dimension_semantics<parallel>, #tpu.dimension_semantics<parallel>], iteration_bounds = array<i64: 1, 1>, scalar_prefetch = 0 : i64, scratch_operands = 0 : i64, tpu.core_type = #tpu.core_type<tc>, window_params = [{transform_indices = @transform_0, window_bounds = array<i64: 128, 128>}, {transform_indices = @transform_1, window_bounds = array<i64: 128, 128>}, {transform_indices = @transform_2, window_bounds = array<i64: 1, 128>}, {transform_indices = @transform_3, window_bounds = array<i64: 128, 128>}]} {
    %c0 = arith.constant 0 : index
    %c0_0 = arith.constant 0 : index
    %0 = vector.load %arg2[%c0, %c0_0] : memref<128x128xbf16, #tpu.memory_space<vmem>>, vector<128x128xbf16>
    %c0_1 = arith.constant 0 : index
    %c0_2 = arith.constant 0 : index
    %1 = vector.load %arg3[%c0_1, %c0_2] : memref<128x128xbf16, #tpu.memory_space<vmem>>, vector<128x128xbf16>
    %cst = arith.constant dense<0.000000e+00> : vector<128x128xf32>
    %2 = tpu.matmul %0, %1, %cst {dimension_numbers = #tpu.dot_dimension_numbers<[1], [0], [0], [1], [0, 0, 1, 1], [], []>} : vector<128x128xbf16>, vector<128x128xbf16>, vector<128x128xf32> -> vector<128x128xf32>
    %c0_3 = arith.constant 0 : index
    %c0_4 = arith.constant 0 : index
    %3 = vector.load %arg4[%c0_3, %c0_4] : memref<1x128xf32, #tpu.memory_space<vmem>>, vector<1x128xf32>
    %4 = vector.broadcast %3 : vector<1x128xf32> to vector<128x128xf32>
    %5 = arith.addf %2, %4 : vector<128x128xf32>
    %6 = arith.truncf %5 : vector<128x128xf32> to vector<128x128xbf16>
    %c0_5 = arith.constant 0 : index
    %c0_6 = arith.constant 0 : index
    %7 = vector.load %arg5[%c0_5, %c0_6] : memref<128x128xbf16, #tpu.memory_space<vmem>>, vector<128x128xbf16>
    tpu.vector_store %arg5[%c0_5, %c0_6], %6 {strides = array<i32>} : memref<128x128xbf16, #tpu.memory_space<vmem>>, vector<128x128xbf16>,
    return
  }
  func.func @transform_0(%arg0: i32, %arg1: i32) -> (i32, i32) {
    %c0_i32 = arith.constant 0 : i32
    %c0_i32_0 = arith.constant 0 : i32
    return %arg0, %c0_i32 : i32, i32
  }
  func.func @transform_1(%arg0: i32, %arg1: i32) -> (i32, i32) {
    %c0_i32 = arith.constant 0 : i32
    %c0_i32_0 = arith.constant 0 : i32
    return %c0_i32, %arg1 : i32, i32
  }
  func.func @transform_2(%arg0: i32, %arg1: i32) -> (i32, i32) {
    %c0_i32 = arith.constant 0 : i32
    %c0_i32_0 = arith.constant 0 : i32
    return %c0_i32, %arg1 : i32, i32
  }
  func.func @transform_3(%arg0: i32, %arg1: i32) -> (i32, i32) {
    %c0_i32 = arith.constant 0 : i32
    return %arg0, %arg1 : i32, i32
  }
}

</mosaic_0001>

<bundles_post_ra>
// kernel: tpu_custom_call.1
= control target key start
LH: loop header
LB: loop body
LE: loop exit
PB: predicated region body
PF: predicated region fallthrough
CT: control target
= control target key end

     0   :  { %8 = vsyncpa [#allocation3], 0  ;;  %s751_s0 = inlined_call_operand.hbm [shape: bf16[128,128], index: 0, kind: input, shape index: {}]   ;;  %s752_s1 = inlined_call_operand.hbm [shape: bf16[128,128], index: 1, kind: input, shape index: {}]   ;;  %s753_s2 = inlined_call_operand.hbm [shape: f32[1,128], index: 2, kind: input, shape index: {}]   ;;  %s754_s3 = inlined_call_operand.hbm [shape: bf16[128,128], index: 3, kind: output, shape index: {}]  }
   0x1   :  { %9 = vsyncpa [#allocation6], 0 }
   0x2   :  { %10 = vsyncpa [#allocation4], 0  ;;  %s661_s12 = smov [#allocation5]   ;;  %s662_s14 = smov [#allocation2]  }
   0x3   :  { %s28_s13 = sshll.u32 %s661_s12, 4  ;;  %s16_s15 = sshll.u32 %s662_s14, 4  ;;  %s29_s13 = int_to_ptr.vmem [resolvable:$true] %s28_s13  ;;  %s687_s15 = int_to_ptr.vmem [resolvable:$true] %s16_s15 }
   0x4   :  { %s567_s18 = scalar_lea.hbm %s752_s1, 1024 }
   0x5   :  { %p568_p0 = scmp.ne.s32.totalorder %s752_s1, %s567_s18  ;;  %p571_p1 = scmp.lt.u32.totalorder %s567_s18, %s752_s1 }
   0x7   :  { %p573_p2 = pnand %p571_p1, %p568_p0 }
   0x9   :  { %576 = shalt.err (!%p573_p2)
}
   0xa   :  { %s577_s23 = scalar_lea.vmem %s29_s13, 1024  ;;  %p582_p4 = scmp.lt.s32.totalorder %s29_s13, %s29_s13 }
   0xb   :  { %p578_p3 = scmp.ne.s32.totalorder %s29_s13, %s577_s23  ;;  %p583_p5 = scmp.lt.s32.totalorder %s577_s23, %s577_s23 }
   0xd   :  { %p584_p6 = por %p583_p5, %p582_p4 }
   0xf   :  { %p585_p7 = pnand %p584_p6, %p578_p3 }
  0x11   :  { %588 = shalt.err (!%p585_p7)
}
  0x12   :  { %s663_s24 = smov 64   ;;  %s664_s25 = smov 4  }
  0x13   :  { %34 = dma.hbm_to_vmem [thread:$0]  %s752_s1, 1024, %s29_s13, [#allocation6], %s663_s24, %s663_s24, %s664_s25  }
  0x14   :  { %s589_s30 = scalar_lea.hbm %s751_s0, 1024 }
  0x15   :  { %p590_p8 = scmp.ne.s32.totalorder %s751_s0, %s589_s30  ;;  %p593_p9 = scmp.lt.u32.totalorder %s589_s30, %s751_s0 }
  0x17   :  { %p595_p10 = pnand %p593_p9, %p590_p8 }
  0x19   :  { %598 = shalt.err (!%p595_p10)
}
  0x1a   :  { %s599_s8 = scalar_lea.vmem %s687_s15, 1024  ;;  %p604_p12 = scmp.lt.s32.totalorder %s687_s15, %s687_s15 }
  0x1b   :  { %p600_p11 = scmp.ne.s32.totalorder %s687_s15, %s599_s8  ;;  %p605_p13 = scmp.lt.s32.totalorder %s599_s8, %s599_s8 }
  0x1d   :  { %p606_p0 = por %p605_p13, %p604_p12 }
  0x1f   :  { %p607_p1 = pnand %p606_p0, %p600_p11 }
  0x21   :  { %610 = shalt.err (!%p607_p1)
}
  0x22   :  { %22 = dma.hbm_to_vmem [thread:$0]  %s751_s0, 1024, %s687_s15, [#allocation3], %s663_s24, %s663_s24, %s664_s25  }
  0x23   :  { %s665_s10 = smov [#allocation7]   ;;  %s611_s14 = scalar_lea.hbm %s753_s2, 16 }
  0x24   :  { %s41_s11 = sshll.u32 %s665_s10, 4  ;;  %p612_p2 = scmp.ne.s32.totalorder %s753_s2, %s611_s14  ;;  %s42_s11 = int_to_ptr.vmem [resolvable:$true] %s41_s11 }
  0x25   :  { %p615_p3 = scmp.lt.u32.totalorder %s611_s14, %s753_s2 }
  0x27   :  { %p617_p4 = pnand %p615_p3, %p612_p2 }
  0x29   :  { %620 = shalt.err (!%p617_p4)
}
  0x2a   :  { %s621_s20 = scalar_lea.vmem %s42_s11, 16  ;;  %s625_s0 = scalar_lea.vmem %s42_s11, 32 }
  0x2b   :  { %p622_p5 = scmp.ne.s32.totalorder %s42_s11, %s621_s20  ;;  %p626_p6 = scmp.lt.s32.totalorder %s42_s11, %s42_s11 }
  0x2c   :  { %p627_p7 = scmp.lt.s32.totalorder %s625_s0, %s621_s20 }
  0x2e   :  { %p628_p8 = por %p627_p7, %p626_p6 }
  0x30   :  { %p629_p9 = pnand %p628_p8, %p622_p5 }
  0x32   :  { %632 = shalt.err (!%p629_p9)
}
  0x33   :  { %44 = dma.hbm_to_vmem [thread:$0]  %s753_s2, 16, %s42_s11, [#allocation6]  }
  0x34   :  { %655 = dma.done.wait [#allocation3], 1024  }
  0x35   :  { %656 = vsyncadd [#allocation3], 4294966272 }
  0x36   :  { %657 = dma.done.wait [#allocation6], 1040  }
  0x37   :  { %658 = vsyncadd [#allocation6], 4294966256  ;;  %v551_v0 = vld [vmem:[#allocation5] sm:$0xff]   ;;  %v552_v1 = vld [vmem:[#allocation5 + $0x8] sm:$0xff]   ;;  %s666_s2 = smov [#allocation8]  }
  0x38   :  { %497 = vmatprep.subr.bf16.mxu0 %v551_v0  ;;  %529 = vmatprep.subr.bf16.mxu1 %v551_v0  ;;  %v553_v2 = vld [vmem:[#allocation5 + $0x10] sm:$0xff]   ;;  %v554_v3 = vld [vmem:[#allocation5 + $0x18] sm:$0xff]   ;;  %v559_v4 = vld [vmem:[#allocation2] sm:$0xff]   ;;  %s372_s22 = sshll.u32 %s666_s2, 4  ;;  %s373_s22 = int_to_ptr.vmem [resolvable:$true] %s372_s22 }
  0x39   :  { %498 = vmatpush3.bf16.msra.mxu0 %v551_v0  ;;  %537 = vmatpush3.bf16.msra.mxu1 %v551_v0  ;;  %v560_v5 = vld [vmem:[#allocation2 + $0x20] sm:$0xff]   ;;  %v556_v7 = vld [vmem:[#allocation5 + $0x28] sm:$0xff]   ;;  %v557_v8 = vld [vmem:[#allocation5 + $0x30] sm:$0xff]   ;;  %s633_s23 = scalar_lea.vmem %s373_s22, 1024  ;;  %p638_p11 = scmp.lt.s32.totalorder %s373_s22, %s373_s22 }
  0x3a   :  { %499 = vmatprep.subr.bf16.mxu0 %v552_v1  ;;  %530 = vmatprep.subr.bf16.mxu1 %v552_v1  ;;  %v555_v6 = vld [vmem:[#allocation5 + $0x20] sm:$0xff]   ;;  %v558_v9 = vld [vmem:[#allocation5 + $0x38] sm:$0xff]   ;;  %v561_v10 = vld [vmem:[#allocation2 + $0x8] sm:$0xff]   ;;  %p634_p10 = scmp.ne.s32.totalorder %s373_s22, %s633_s23  ;;  %p639_p12 = scmp.lt.s32.totalorder %s633_s23, %s633_s23 }
  0x3b   :  { %513 = vmatprep.mubr.bf16.mxu0 %v559_v4  ;;  %521 = vmatprep.mubr.bf16.mxu1 %v560_v5  ;;  %v562_v11 = vld [vmem:[#allocation2 + $0x28] sm:$0xff]   ;;  %v563_v12 = vld [vmem:[#allocation2 + $0x10] sm:$0xff]   ;;  %v565_v14 = vld [vmem:[#allocation2 + $0x18] sm:$0xff]  }
  0x3c   :  { %v564_v13 = vld [vmem:[#allocation2 + $0x30] sm:$0xff]   ;;  %v566_v15 = vld [vmem:[#allocation2 + $0x38] sm:$0xff]   ;;  %v385_v17 = vld [vmem:[#allocation7] ss:$0 sm:$0xff]  ;;  %p640_p13 = por %p639_p12, %p638_p11 }
  0x3d   :  { %500 = vmatpush3.bf16.msra.mxu0 %v552_v1  ;;  %538 = vmatpush3.bf16.msra.mxu1 %v552_v1 }
  0x3e   :  { %501 = vmatprep.subr.bf16.mxu0 %v553_v2  ;;  %531 = vmatprep.subr.bf16.mxu1 %v553_v2  ;;  %p641_p0 = pnand %p640_p13, %p634_p10 }
  0x41   :  { %502 = vmatpush3.bf16.msra.mxu0 %v553_v2  ;;  %539 = vmatpush3.bf16.msra.mxu1 %v553_v2 }
  0x42   :  { %503 = vmatprep.subr.bf16.mxu0 %v554_v3  ;;  %532 = vmatprep.subr.bf16.mxu1 %v554_v3 }
  0x45   :  { %504 = vmatpush3.bf16.msra.mxu0 %v554_v3  ;;  %540 = vmatpush3.bf16.msra.mxu1 %v554_v3 }
  0x46   :  { %505 = vmatprep.subr.bf16.mxu0 %v555_v6  ;;  %533 = vmatprep.subr.bf16.mxu1 %v555_v6 }
  0x49   :  { %506 = vmatpush3.bf16.msra.mxu0 %v555_v6  ;;  %541 = vmatpush3.bf16.msra.mxu1 %v555_v6 }
  0x4a   :  { %507 = vmatprep.subr.bf16.mxu0 %v556_v7  ;;  %534 = vmatprep.subr.bf16.mxu1 %v556_v7 }
  0x4d   :  { %508 = vmatpush3.bf16.msra.mxu0 %v556_v7  ;;  %542 = vmatpush3.bf16.msra.mxu1 %v556_v7 }
  0x4e   :  { %509 = vmatprep.subr.bf16.mxu0 %v557_v8  ;;  %535 = vmatprep.subr.bf16.mxu1 %v557_v8 }
  0x51   :  { %510 = vmatpush3.bf16.msra.mxu0 %v557_v8  ;;  %543 = vmatpush3.bf16.msra.mxu1 %v557_v8 }
  0x52   :  { %511 = vmatprep.subr.bf16.mxu0 %v558_v9  ;;  %536 = vmatprep.subr.bf16.mxu1 %v558_v9 }
  0x55   :  { %512 = vmatpush3.bf16.msra.mxu0 %v558_v9  ;;  %544 = vmatpush3.bf16.msra.mxu1 %v558_v9 }
  0x58   :  { %514 = vmatmul.mubr.bf16.vlgmr.msra.gmra.mrb[0].mxu0 %v561_v10  ;;  %522 = vmatmul.mubr.bf16.vlgmr.msra.gmra.mrb[0].mxu1 %v562_v11 }
  0x59   :  { %517 = vmatprep.mubr.bf16.mxu0 %v563_v12  ;;  %525 = vmatprep.mubr.bf16.mxu1 %v564_v13 }
  0x60   :  { %518 = vmatmul.mubr.bf16.gmra.mrb[4].mxu0 %v565_v14  ;;  %526 = vmatmul.mubr.bf16.gmra.mrb[4].mxu1 %v566_v15 }
 0x12b   :  { %v515_v16 = vpop.f32.mrb[0].mxu0  ;;  %v523_v18 = vpop.f32.mrb[0].mxu1 }
 0x12c   :  { %v224_v19 = vpop.f32.mrb[1].mxu0  ;;  %v256_v20 = vpop.f32.mrb[1].mxu1  ;;  %v233_v23 = vadd.f32 %v515_v16, %v385_v17  ;;  %v265_v24 = vadd.f32 %v523_v18, %v385_v17 }
 0x12d   :  { %v516_v21 = vpop.f32.mrb[2].mxu0  ;;  %v524_v22 = vpop.f32.mrb[2].mxu1  ;;  %v225_v29 = vadd.f32 %v385_v17, %v224_v19  ;;  %v257_v30 = vadd.f32 %v385_v17, %v256_v20 }
 0x12e   :  { %v236_v25 = vadd.f32 %v516_v21, %v385_v17  ;;  %v268_v26 = vadd.f32 %v524_v22, %v385_v17  ;;  %v227_v27 = vpop.f32.mrb[3].mxu0  ;;  %v259_v28 = vpop.f32.mrb[3].mxu1 }
 0x12f   :  { %v228_v31 = vadd.f32 %v385_v17, %v227_v27  ;;  %v260_v32 = vadd.f32 %v385_v17, %v259_v28 }
 0x130   :  { %v442_v33 = vpack.c.bf16 %v236_v25, %v233_v23  ;;  %v462_v34 = vpack.c.bf16 %v268_v26, %v265_v24 }
 0x131   :  { %v437_v35 = vpack.c.bf16 %v228_v31, %v225_v29  ;;  %v457_v36 = vpack.c.bf16 %v260_v32, %v257_v30 }
 0x132   :  { %474 = vst [vmem:[#allocation8 + $0x8] sm:$0xff] %v442_v33   ;;  %478 = vst [vmem:[#allocation8 + $0x28] sm:$0xff] %v462_v34  }
 0x133   :  { %438 = vst [vmem:[#allocation8] sm:$0xff] %v437_v35   ;;  %477 = vst [vmem:[#allocation8 + $0x20] sm:$0xff] %v457_v36   ;;  %v519_v37 = vpop.f32.mrb[4].mxu0  ;;  %v527_v38 = vpop.f32.mrb[4].mxu1 }
 0x134   :  { %v240_v39 = vpop.f32.mrb[5].mxu0  ;;  %v272_v40 = vpop.f32.mrb[5].mxu1  ;;  %v249_v43 = vadd.f32 %v519_v37, %v385_v17  ;;  %v281_v44 = vadd.f32 %v527_v38, %v385_v17 }
 0x135   :  { %v520_v41 = vpop.f32.mrb[6].mxu0  ;;  %v528_v42 = vpop.f32.mrb[6].mxu1  ;;  %v241_v49 = vadd.f32 %v385_v17, %v240_v39  ;;  %v273_v50 = vadd.f32 %v385_v17, %v272_v40 }
 0x136   :  { %v252_v45 = vadd.f32 %v520_v41, %v385_v17  ;;  %v284_v46 = vadd.f32 %v528_v42, %v385_v17  ;;  %v243_v47 = vpop.f32.mrb[7].mxu0  ;;  %v275_v48 = vpop.f32.mrb[7].mxu1 }
 0x137   :  { %v244_v51 = vadd.f32 %v385_v17, %v243_v47  ;;  %v276_v52 = vadd.f32 %v385_v17, %v275_v48 }
 0x138   :  { %v452_v53 = vpack.c.bf16 %v252_v45, %v249_v43  ;;  %v472_v54 = vpack.c.bf16 %v284_v46, %v281_v44 }
 0x139   :  { %v447_v55 = vpack.c.bf16 %v244_v51, %v241_v49  ;;  %v467_v56 = vpack.c.bf16 %v276_v52, %v273_v50 }
 0x13a   :  { %476 = vst [vmem:[#allocation8 + $0x18] sm:$0xff] %v452_v53   ;;  %480 = vst [vmem:[#allocation8 + $0x38] sm:$0xff] %v472_v54  }
 0x13b   :  { %475 = vst [vmem:[#allocation8 + $0x10] sm:$0xff] %v447_v55   ;;  %479 = vst [vmem:[#allocation8 + $0x30] sm:$0xff] %v467_v56  }
 0x13c   :  { %644 = shalt.err (!%p641_p0)
}
 0x13d   :  { %s645_s28 = scalar_lea.hbm %s754_s3, 1024 }
 0x13e   :  { %p646_p1 = scmp.ne.s32.totalorder %s754_s3, %s645_s28  ;;  %p649_p2 = scmp.lt.u32.totalorder %s645_s28, %s754_s3 }
 0x140   :  { %p651_p3 = pnand %p649_p2, %p646_p1 }
 0x142   :  { %654 = shalt.err (!%p651_p3)
}
 0x143   :  { %378 = dma.vmem_to_hbm [thread:$0]  %s373_s22, 1024, %s754_s3, [#allocation4], %s663_s24, %s663_s24, %s664_s25  }
 0x144   :  { %659 = dma.done.wait [#allocation4], 1024  }
 0x145   :  { %660 = vsyncadd [#allocation4], 4294966272 }
 0x146   :  { %382 = vsyncpa [#allocation3], 1 }
 0x147   :  { %383 = vsyncpa [#allocation6], 1 }
 0x148   :  { %384 = vsyncpa [#allocation4], 1 }

</bundles_post_ra>
